<compile_context>
chip_gen: v7x
topology: tpu7x:2x2x1
jax: 0.10.0
libtpu: 0.0.40
codegen_flags: <defaults>
</compile_context>

<pallas_src>
import math
import jax
import jax.numpy as jnp
from jax.experimental import pallas as pl
from jax.experimental.pallas import tpu as pltpu


def _round_up(x, m):
    return (x + m - 1) // m * m


def _proj_kernel(x_ref, w1_ref, b1_ref, g_ref, beta_ref, w2_ref, b2_ref, o_ref):
    """Fused Linear -> LayerNorm -> GELU -> Linear on one (branch, batch-tile) block."""
    # Linear 1: [TM, D] @ [D, D] on the MXU in native dtype, f32 accumulation.
    h = jnp.dot(x_ref[...], w1_ref[...], preferred_element_type=jnp.float32)
    h = h + b1_ref[...].astype(jnp.float32)

    # LayerNorm over the feature dim (biased variance, eps=1e-5), affine — f32 elementwise.
    mean = jnp.mean(h, axis=-1, keepdims=True)
    c = h - mean
    var = jnp.mean(c * c, axis=-1, keepdims=True)
    hn = c * jax.lax.rsqrt(var + 1e-5)
    hn = hn * g_ref[...].astype(jnp.float32) + beta_ref[...].astype(jnp.float32)

    # Exact GELU (erf form) — matches torch.nn.GELU() default.
    act = 0.5 * hn * (1.0 + jax.lax.erf(hn * (1.0 / math.sqrt(2.0))))

    # Linear 2: cast activations to the weight dtype (bf16 weights -> MXU bf16 path),
    # f32 accumulation.  Output lane width is padded to a multiple of 128 (lane-dense store).
    out = jnp.dot(act.astype(w2_ref.dtype), w2_ref[...],
                  preferred_element_type=jnp.float32)
    out = out + b2_ref[...].astype(jnp.float32)
    o_ref[...] = out.astype(o_ref.dtype)


def retriever_forward(text_embedding, visual_embedding, visual_params, text_params):
    """Both projection branches in one pallas_call.  Returns (visual_out, text_out)."""
    assert text_embedding.shape == visual_embedding.shape
    B, D = visual_embedding.shape
    O = visual_params[4].shape[1]
    out_dtype = visual_embedding.dtype
    param_itemsize = jnp.dtype(visual_params[0].dtype).itemsize

    # Lane-dense output: pad output features up to a multiple of 128.
    O_pad = _round_up(O, 128)
    # Batch tile: at least 128 rows per matmul (256 cap), pad batch to a multiple of it.
    TM = min(256, _round_up(max(B, 128), 128))
    B_pad = _round_up(B, TM)

    # Stack the two branches: index 0 = visual, 1 = text.
    x = jnp.stack([visual_embedding, text_embedding])                     # (2, B, D)
    x = jnp.pad(x, ((0, 0), (0, B_pad - B), (0, 0)))                      # (2, B_pad, D)

    def stack_params(vp, tp):
        w1 = jnp.stack([vp[0], tp[0]])                                    # (2, D, D)
        b1 = jnp.stack([vp[1], tp[1]])                                    # (2, 1, D)
        g = jnp.stack([vp[2], tp[2]])                                     # (2, 1, D)
        beta = jnp.stack([vp[3], tp[3]])                                  # (2, 1, D)
        w2 = jnp.pad(jnp.stack([vp[4], tp[4]]),
                     ((0, 0), (0, 0), (0, O_pad - O)))                    # (2, D, O_pad)
        b2 = jnp.pad(jnp.stack([vp[5], tp[5]]),
                     ((0, 0), (0, 0), (0, O_pad - O)))                    # (2, 1, O_pad)
        return w1, b1, g, beta, w2, b2

    w1, b1, g, beta, w2, b2 = stack_params(visual_params, text_params)

    grid = (2, B_pad // TM)

    # Advisory cost estimate for the XLA scheduler.
    flops = 2 * B_pad * 2 * D * (D + O_pad)          # 2 branches, 2 matmuls each
    transcendentals = 2 * B_pad * D                  # erf per LN-ed element
    bytes_accessed = (x.size * x.dtype.itemsize
                      + sum(int(p.size) * param_itemsize for p in (w1, b1, g, beta, w2, b2))
                      + 2 * B_pad * O_pad * jnp.dtype(out_dtype).itemsize)

    # VMEM budget (only raise the scoped limit if the resident set is actually large,
    # e.g. big D on v7x with its 64 MiB physical / 32 MiB default scoped VMEM).
    weight_bytes = (D * D + 3 * D + D * O_pad + O_pad) * param_itemsize
    act_bytes = TM * D * x.dtype.itemsize + TM * O_pad * jnp.dtype(out_dtype).itemsize
    vmem_est = 2 * (weight_bytes + act_bytes)        # assume everything double-buffered
    vmem_limit = None
    if vmem_est > 30 * 1024 * 1024:
        vmem_limit = min(int(vmem_est * 5 // 4), 110 * 1024 * 1024)

    out = pl.pallas_call(
        _proj_kernel,
        out_shape=jax.ShapeDtypeStruct((2, B_pad, O_pad), out_dtype),
        grid=grid,
        in_specs=[
            # x: tiled over (branch, batch); branch dim squeezed out of the kernel ref.
            pl.BlockSpec((None, TM, D), lambda b, i: (b, i, 0)),
            # Weights / LN params: constant over the batch axis -> VMEM-resident per branch.
            pl.BlockSpec((None, D, D), lambda b, i: (b, 0, 0)),        # w1
            pl.BlockSpec((None, 1, D), lambda b, i: (b, 0, 0)),        # b1
            pl.BlockSpec((None, 1, D), lambda b, i: (b, 0, 0)),        # gamma
            pl.BlockSpec((None, 1, D), lambda b, i: (b, 0, 0)),        # beta
            pl.BlockSpec((None, D, O_pad), lambda b, i: (b, 0, 0)),    # w2 (lane-padded)
            pl.BlockSpec((None, 1, O_pad), lambda b, i: (b, 0, 0)),    # b2 (lane-padded)
        ],
        out_specs=pl.BlockSpec((None, TM, O_pad), lambda b, i: (b, i, 0)),
        compiler_params=pltpu.CompilerParams(
            dimension_semantics=("parallel", "parallel"),
            vmem_limit_bytes=vmem_limit,
        ),
        cost_estimate=pl.CostEstimate(
            flops=flops, transcendentals=transcendentals, bytes_accessed=bytes_accessed),
    )(x, w1, b1, g, beta, w2, b2)

    visual_out = out[0, :B, :O]
    text_out = out[1, :B, :O]
    return visual_out, text_out


def init_branch_params(key, input_dim, output_dim, dtype=jnp.float32):
    """Deterministic synthetic init matching the PyTorch parameter shapes."""
    k1, k2, k3, k4 = jax.random.split(key, 4)
    # Linear(input_dim, input_dim): stored as [D, D] (in, out) and [1, D]
    w1 = jax.random.normal(k1, (input_dim, input_dim), dtype) * 0.02
    b1 = jax.random.normal(k2, (1, input_dim), dtype) * 0.01
    # LayerNorm(input_dim): gamma=1, beta=0 (PyTorch default init)
    gamma = jnp.ones((1, input_dim), dtype)
    beta = jnp.zeros((1, input_dim), dtype)
    # Linear(input_dim, output_dim)
    w2 = jax.random.normal(k3, (input_dim, output_dim), dtype) * 0.02
    b2 = jax.random.normal(k4, (1, output_dim), dtype) * 0.01
    return (w1, b1, gamma, beta, w2, b2)


def reference_projection(x, params):
    """Plain-JAX reference for correctness check."""
    w1, b1, gamma, beta, w2, b2 = params
    h = x @ w1 + b1
    mean = jnp.mean(h, axis=-1, keepdims=True)
    var = jnp.mean((h - mean) ** 2, axis=-1, keepdims=True)
    hn = (h - mean) / jnp.sqrt(var + 1e-5)
    hn = hn * gamma + beta
    act = 0.5 * hn * (1.0 + jax.lax.erf(hn / jnp.sqrt(2.0)))
    return act @ w2 + b2


if __name__ == "__main__":
    # Small shapes implied by the module: embeddings are [batch, input_dim].
    batch = 8
    input_dim = 128
    output_dim = 64

    key = jax.random.PRNGKey(0)
    k_text, k_vis, k_vp, k_tp = jax.random.split(key, 4)

    text_embedding = jax.random.normal(k_text, (batch, input_dim), jnp.float32)
    visual_embedding = jax.random.normal(k_vis, (batch, input_dim), jnp.float32)

    visual_params = init_branch_params(k_vp, input_dim, output_dim)
    text_params = init_branch_params(k_tp, input_dim, output_dim)

    visual_out, text_out = retriever_forward(
        text_embedding, visual_embedding, visual_params, text_params
    )
    jax.block_until_ready((visual_out, text_out))

    # Sanity check against a pure-JAX reference.
    ref_visual = reference_projection(visual_embedding, visual_params)
    ref_text = reference_projection(text_embedding, text_params)
    assert visual_out.shape == (batch, output_dim)
    assert text_out.shape == (batch, output_dim)
    assert jnp.allclose(visual_out, ref_visual, atol=1e-4, rtol=1e-4)
    assert jnp.allclose(text_out, ref_text, atol=1e-4, rtol=1e-4)

    print("KERNEL_OK")
</pallas_src>

<mosaic_0001>
module attributes {stable_mosaic.version = 11 : i64} {
  func.func @_proj_kernel(%arg0: i32, %arg1: i32, %arg2: memref<1x128x128xf32, #tpu.memory_space<vmem>>, %arg3: memref<1x128x128xf32, #tpu.memory_space<vmem>>, %arg4: memref<1x1x128xf32, #tpu.memory_space<vmem>>, %arg5: memref<1x1x128xf32, #tpu.memory_space<vmem>>, %arg6: memref<1x1x128xf32, #tpu.memory_space<vmem>>, %arg7: memref<1x128x128xf32, #tpu.memory_space<vmem>>, %arg8: memref<1x1x128xf32, #tpu.memory_space<vmem>>, %arg9: memref<1x128x128xf32, #tpu.memory_space<vmem>>) attributes {dimension_semantics = [#tpu.dimension_semantics<parallel>, #tpu.dimension_semantics<parallel>], iteration_bounds = array<i64: 2, 1>, scalar_prefetch = 0 : i64, scratch_operands = 0 : i64, tpu.core_type = #tpu.core_type<tc>, window_params = [{transform_indices = @transform_0, window_bounds = array<i64: 1, 128, 128>}, {transform_indices = @transform_1, window_bounds = array<i64: 1, 128, 128>}, {transform_indices = @transform_2, window_bounds = array<i64: 1, 1, 128>}, {transform_indices = @transform_3, window_bounds = array<i64: 1, 1, 128>}, {transform_indices = @transform_4, window_bounds = array<i64: 1, 1, 128>}, {transform_indices = @transform_5, window_bounds = array<i64: 1, 128, 128>}, {transform_indices = @transform_6, window_bounds = array<i64: 1, 1, 128>}, {transform_indices = @transform_7, window_bounds = array<i64: 1, 128, 128>}]} {
    %c0 = arith.constant 0 : index
    %c0_0 = arith.constant 0 : index
    %c0_1 = arith.constant 0 : index
    %0 = vector.load %arg2[%c0, %c0_0, %c0_1] : memref<1x128x128xf32, #tpu.memory_space<vmem>>, vector<1x128x128xf32>
    %1 = vector.shape_cast %0 : vector<1x128x128xf32> to vector<128x128xf32>
    %c0_2 = arith.constant 0 : index
    %c0_3 = arith.constant 0 : index
    %c0_4 = arith.constant 0 : index
    %2 = vector.load %arg3[%c0_2, %c0_3, %c0_4] : memref<1x128x128xf32, #tpu.memory_space<vmem>>, vector<1x128x128xf32>
    %3 = vector.shape_cast %2 : vector<1x128x128xf32> to vector<128x128xf32>
    %cst = arith.constant dense<0.000000e+00> : vector<128x128xf32>
    %4 = tpu.matmul %1, %3, %cst {dimension_numbers = #tpu.dot_dimension_numbers<[1], [0], [0], [1], [0, 0, 1, 1], [], []>} : vector<128x128xf32>, vector<128x128xf32>, vector<128x128xf32> -> vector<128x128xf32>
    %c0_5 = arith.constant 0 : index
    %c0_6 = arith.constant 0 : index
    %c0_7 = arith.constant 0 : index
    %5 = vector.load %arg4[%c0_5, %c0_6, %c0_7] : memref<1x1x128xf32, #tpu.memory_space<vmem>>, vector<1x1x128xf32>
    %6 = vector.shape_cast %5 : vector<1x1x128xf32> to vector<1x128xf32>
    %7 = vector.broadcast %6 : vector<1x128xf32> to vector<128x128xf32>
    %8 = arith.addf %4, %7 : vector<128x128xf32>
    %cst_8 = arith.constant dense<0.000000e+00> : vector<128xf32>
    %9 = vector.multi_reduction <add>, %8, %cst_8 [1] : vector<128x128xf32> to vector<128xf32>
    %10 = vector.shape_cast %9 : vector<128xf32> to vector<128x1xf32>
    %cst_9 = arith.constant 1.280000e+02 : f32
    %11 = vector.broadcast %cst_9 : f32 to vector<128x1xf32>
    %12 = arith.divf %10, %11 : vector<128x1xf32>
    %13 = vector.broadcast %12 : vector<128x1xf32> to vector<128x128xf32>
    %14 = arith.subf %8, %13 : vector<128x128xf32>
    %15 = arith.mulf %14, %14 : vector<128x128xf32>
    %cst_10 = arith.constant dense<0.000000e+00> : vector<128xf32>
    %16 = vector.multi_reduction <add>, %15, %cst_10 [1] : vector<128x128xf32> to vector<128xf32>
    %17 = vector.shape_cast %16 : vector<128xf32> to vector<128x1xf32>
    %cst_11 = arith.constant 1.280000e+02 : f32
    %18 = vector.broadcast %cst_11 : f32 to vector<128x1xf32>
    %19 = arith.divf %17, %18 : vector<128x1xf32>
    %cst_12 = arith.constant 9.99999974E-6 : f32
    %20 = vector.broadcast %cst_12 : f32 to vector<128x1xf32>
    %21 = arith.addf %19, %20 : vector<128x1xf32>
    %22 = math.rsqrt %21 : vector<128x1xf32>
    %23 = vector.broadcast %22 : vector<128x1xf32> to vector<128x128xf32>
    %24 = arith.mulf %14, %23 : vector<128x128xf32>
    %c0_13 = arith.constant 0 : index
    %c0_14 = arith.constant 0 : index
    %c0_15 = arith.constant 0 : index
    %25 = vector.load %arg5[%c0_13, %c0_14, %c0_15] : memref<1x1x128xf32, #tpu.memory_space<vmem>>, vector<1x1x128xf32>
    %26 = vector.shape_cast %25 : vector<1x1x128xf32> to vector<1x128xf32>
    %27 = vector.broadcast %26 : vector<1x128xf32> to vector<128x128xf32>
    %28 = arith.mulf %24, %27 : vector<128x128xf32>
    %c0_16 = arith.constant 0 : index
    %c0_17 = arith.constant 0 : index
    %c0_18 = arith.constant 0 : index
    %29 = vector.load %arg6[%c0_16, %c0_17, %c0_18] : memref<1x1x128xf32, #tpu.memory_space<vmem>>, vector<1x1x128xf32>
    %30 = vector.shape_cast %29 : vector<1x1x128xf32> to vector<1x128xf32>
    %31 = vector.broadcast %30 : vector<1x128xf32> to vector<128x128xf32>
    %32 = arith.addf %28, %31 : vector<128x128xf32>
    %cst_19 = arith.constant 5.000000e-01 : f32
    %33 = vector.broadcast %cst_19 : f32 to vector<128x128xf32>
    %34 = arith.mulf %33, %32 : vector<128x128xf32>
    %cst_20 = arith.constant 0.707106769 : f32
    %35 = vector.broadcast %cst_20 : f32 to vector<128x128xf32>
    %36 = arith.mulf %32, %35 : vector<128x128xf32>
    %37 = math.erf %36 : vector<128x128xf32>
    %cst_21 = arith.constant 1.000000e+00 : f32
    %38 = vector.broadcast %cst_21 : f32 to vector<128x128xf32>
    %39 = arith.addf %38, %37 : vector<128x128xf32>
    %40 = arith.mulf %34, %39 : vector<128x128xf32>
    %c0_22 = arith.constant 0 : index
    %c0_23 = arith.constant 0 : index
    %c0_24 = arith.constant 0 : index
    %41 = vector.load %arg7[%c0_22, %c0_23, %c0_24] : memref<1x128x128xf32, #tpu.memory_space<vmem>>, vector<1x128x128xf32>
    %42 = vector.shape_cast %41 : vector<1x128x128xf32> to vector<128x128xf32>
    %cst_25 = arith.constant dense<0.000000e+00> : vector<128x128xf32>
    %43 = tpu.matmul %40, %42, %cst_25 {dimension_numbers = #tpu.dot_dimension_numbers<[1], [0], [0], [1], [0, 0, 1, 1], [], []>} : vector<128x128xf32>, vector<128x128xf32>, vector<128x128xf32> -> vector<128x128xf32>
    %c0_26 = arith.constant 0 : index
    %c0_27 = arith.constant 0 : index
    %c0_28 = arith.constant 0 : index
    %44 = vector.load %arg8[%c0_26, %c0_27, %c0_28] : memref<1x1x128xf32, #tpu.memory_space<vmem>>, vector<1x1x128xf32>
    %45 = vector.shape_cast %44 : vector<1x1x128xf32> to vector<1x128xf32>
    %46 = vector.broadcast %45 : vector<1x128xf32> to vector<128x128xf32>
    %47 = arith.addf %43, %46 : vector<128x128xf32>
    %c0_29 = arith.constant 0 : index
    %c0_30 = arith.constant 0 : index
    %c0_31 = arith.constant 0 : index
    %48 = vector.load %arg9[%c0_29, %c0_30, %c0_31] : memref<1x128x128xf32, #tpu.memory_space<vmem>>, vector<1x128x128xf32>
    %49 = vector.shape_cast %48 : vector<1x128x128xf32> to vector<128x128xf32>
    %50 = vector.shape_cast %47 : vector<128x128xf32> to vector<1x128x128xf32>
    tpu.vector_store %arg9[%c0_29, %c0_30, %c0_31], %50 {strides = array<i32>} : memref<1x128x128xf32, #tpu.memory_space<vmem>>, vector<1x128x128xf32>,
    return
  }
  func.func @transform_0(%arg0: i32, %arg1: i32) -> (i32, i32, i32) {
    %c0_i32 = arith.constant 0 : i32
    %c0_i32_0 = arith.constant 0 : i32
    return %arg0, %arg1, %c0_i32 : i32, i32, i32
  }
  func.func @transform_1(%arg0: i32, %arg1: i32) -> (i32, i32, i32) {
    %c0_i32 = arith.constant 0 : i32
    %c0_i32_0 = arith.constant 0 : i32
    %c0_i32_1 = arith.constant 0 : i32
    return %arg0, %c0_i32, %c0_i32_0 : i32, i32, i32
  }
  func.func @transform_2(%arg0: i32, %arg1: i32) -> (i32, i32, i32) {
    %c0_i32 = arith.constant 0 : i32
    %c0_i32_0 = arith.constant 0 : i32
    %c0_i32_1 = arith.constant 0 : i32
    return %arg0, %c0_i32, %c0_i32_0 : i32, i32, i32
  }
  func.func @transform_3(%arg0: i32, %arg1: i32) -> (i32, i32, i32) {
    %c0_i32 = arith.constant 0 : i32
    %c0_i32_0 = arith.constant 0 : i32
    %c0_i32_1 = arith.constant 0 : i32
    return %arg0, %c0_i32, %c0_i32_0 : i32, i32, i32
  }
  func.func @transform_4(%arg0: i32, %arg1: i32) -> (i32, i32, i32) {
    %c0_i32 = arith.constant 0 : i32
    %c0_i32_0 = arith.constant 0 : i32
    %c0_i32_1 = arith.constant 0 : i32
    return %arg0, %c0_i32, %c0_i32_0 : i32, i32, i32
  }
  func.func @transform_5(%arg0: i32, %arg1: i32) -> (i32, i32, i32) {
    %c0_i32 = arith.constant 0 : i32
    %c0_i32_0 = arith.constant 0 : i32
    %c0_i32_1 = arith.constant 0 : i32
    return %arg0, %c0_i32, %c0_i32_0 : i32, i32, i32
  }
  func.func @transform_6(%arg0: i32, %arg1: i32) -> (i32, i32, i32) {
    %c0_i32 = arith.constant 0 : i32
    %c0_i32_0 = arith.constant 0 : i32
    %c0_i32_1 = arith.constant 0 : i32
    return %arg0, %c0_i32, %c0_i32_0 : i32, i32, i32
  }
  func.func @transform_7(%arg0: i32, %arg1: i32) -> (i32, i32, i32) {
    %c0_i32 = arith.constant 0 : i32
    %c0_i32_0 = arith.constant 0 : i32
    return %arg0, %arg1, %c0_i32 : i32, i32, i32
  }
}

</mosaic_0001>

<bundles_post_ra>
// kernel: tpu_custom_call.1
= control target key start
LH: loop header
LB: loop body
LE: loop exit
PB: predicated region body
PF: predicated region fallthrough
CT: control target
= control target key end

     0   :  { %s2497_s0 = inlined_call_operand.hbm [shape: f32[2,128,128], index: 0, kind: input, shape index: {}]   ;;  %s2498_s1 = inlined_call_operand.hbm [shape: f32[2,128,128], index: 1, kind: input, shape index: {}]   ;;  %s2499_s2 = inlined_call_operand.vmem [shape: f32[2,1,128], index: 2, kind: input, shape index: {}]   ;;  %s2500_s3 = inlined_call_operand.vmem [shape: f32[2,1,128], index: 3, kind: input, shape index: {}]   ;;  %s2501_s4 = inlined_call_operand.vmem [shape: f32[2,1,128], index: 4, kind: input, shape index: {}]   ;;  %s2502_s5 = inlined_call_operand.hbm [shape: f32[2,128,128], index: 5, kind: input, shape index: {}]   ;;  %s2503_s6 = inlined_call_operand.vmem [shape: f32[2,1,128], index: 6, kind: input, shape index: {}]   ;;  %s2504_s7 = inlined_call_operand.hbm [shape: f32[2,128,128], index: 7, kind: output, shape index: {}]  }
   0x1   :  { %2519 = sst [smem:[#allocation18_spill]] %s2498_s1 }
   0x2   :  { %2520 = sst [smem:[#allocation19_spill]] %s2504_s7 }
   0x3   :  { %12 = vsyncpa [#allocation3], 0 }
   0x4   :  { %14 = vsyncpa [#allocation3 + $0x1], 0 }
   0x5   :  { %15 = vsyncpa [#allocation6], 0 }
   0x6   :  { %17 = vsyncpa [#allocation6 + $0x1], 0 }
   0x7   :  { %18 = vsyncpa [#allocation4], 0 }
   0x8   :  { %20 = vsyncpa [#allocation4 + $0x1], 0  ;;  %s1940_s24 = smov 0   ;;  %s1942_s25 = smov 0  }
   0x9   :  { %s1944_s26 = smov 0   ;;  %s1946_s27 = smov 0  }
   0xa   :  { %s1948_s28 = smov 0   ;;  %s1950_s29 = smov 0  }
   0xb LB: > { %2521 = sst [smem:[#allocation12_spill]] %s1870_s24  ;;  %s1971_s30 = sadd.s32 4294967295, %s1890_s29   ;;  %s1890_s29 = sphi %s1950_s29, %s26_s29   ;;  %s1886_s28 = sphi %s1948_s28, %s2551_s28   ;;  %s1882_s27 = sphi %s1946_s27, %s2550_s27   ;;  %s1878_s26 = sphi %s1944_s26, %s2554_s26   ;;  %s1874_s25 = sphi %s1942_s25, %s2553_s25   ;;  %s1870_s24 = sphi %s1940_s24, %s2552_s24  }
   0xc   : > { %2522 = sst [smem:[#allocation13_spill]] %s1886_s28  ;;  %s1304_s8 = sadd.s32 4294967294, %s1890_s29  }
   0xd   : > { %2523 = sst [smem:[#allocation14_spill]] %s1890_s29  ;;  %s38_s9 = sadd.s32 1, %s1886_s28 }
   0xe   : > { %s47_s10 = sadd.s32 1, %s1878_s26  ;;  %p40_p0 = scmp.ge.s32.totalorder %s38_s9, 2 }
   0xf   : > { %p54_p1 = scmp.ne.s32.totalorder %s1878_s26, %s1874_s25  ;;  %p55_p2 = scmp.eq.s32.totalorder %s1890_s29, 0 }
  0x10   : > { %p60_p3 = scmp.ne.s32.totalorder %s1874_s25, %s1870_s24  ;;  %s2556_s9 = smov (%p40_p0, %s38_s9), 0 }
  0x11   : > { %2524 = sst [smem:[#allocation15_spill]] %s2556_s9  ;;  %p1983_p4 = por %p55_p2, %p54_p1 }
  0x12   : > { %p61_p5 = scmp.eq.s32.totalorder %s1971_s30, 0  ;;  %s42_s12 = ssub.s32 %s1886_s28, %s2556_s9 }
  0x13   : > { %p242_p6 = scmp.eq.s32.totalorder %s1971_s30, 1  ;;  %p45_p7 = scmp.eq.s32.totalorder %s42_s12, 0 }
  0x14   : > { %p1991_p8 = por %p61_p5, %p60_p3  ;;  %p248_p10 = scmp.eq.s32.totalorder %s1304_s8, 1 }
  0x15   : > { %p1995_p9 = por %p242_p6, %p54_p1  ;;  %p1596_p13 = scmp.lt.s32.totalorder %s1890_s29, 2 }
  0x16   : > { %s2526_s13 = scalar_select %p1991_p8, 1, 0 }
  0x17   : > { %s2527_s14 = scalar_select %p1995_p9, 1, 0 }
  0x18   : > { %s2000_s15 = scalar_select %p45_p7, %s1878_s26, %s47_s10  }
  0x19   : > { %p2002_p11 = por %p248_p10, %p60_p3  ;;  %s2505_s17 = sand.u32 1, %s1878_s26  }
  0x1a   : > { %2528 = sst [smem:[#allocation16_spill]] %s2000_s15  ;;  %s2011_s18 = sshll.u32 %s2505_s17, 7 }
  0x1b   : > { %s2529_s16 = scalar_select %p2002_p11, 1, 0 }
  0x1c   : > { %s2014_s19 = sshll.u32 %s1886_s28, 11  ;;  %p2018_p0 = pnand %p1596_p13, %p1983_p4 }
  0x1d   : > { %2530 = sst [smem:[#allocation17_spill]] %s2529_s16  ;;  %s291_s21 = sand.u32 1, %s1890_s29  }
  0x1e   : > { %s2532_s1 = sld [smem:[#allocation18_spill]]  ;;  %s295_s10 = scalar_lea.vmem [#allocation5], %s2011_s18 }
  0x1f   : > { %s302_s12 = sshll.u32 %s295_s10, 4  ;;  %s2034_s11 = scalar_lea.sflag [#allocation6], %s291_s21  ;;  %s2031_s12 = int_to_ptr.vmem [resolvable:$true] %s302_s12 }
  0x20   : > { %p2040_p4 = pneg %p2018_p0 }
  0x24   : > { %s2027_s8 = scalar_lea.hbm %s2532_s1, %s2014_s19  ;;  %s1719_s10 = scalar_lea.hbm %s2532_s1, 4096 }
  0x25   : > { %s1714_s17 = scalar_lea.hbm %s2027_s8, 2048  ;;  %p1720_p7 = scmp.lt.u32.totalorder %s2027_s8, %s2532_s1 }
  0x26   : > { %p1715_p3 = scmp.ne.s32.totalorder %s2027_s8, %s1714_s17  ;;  %p1721_p10 = scmp.lt.u32.totalorder %s1719_s10, %s1714_s17 }
  0x27   : > { %p1723_p12 = scmp.lt.u32.totalorder %s1714_s17, %s2027_s8 }
  0x28   : > { %p1717_p5 = pnand %p2040_p4, %p1715_p3  ;;  %p1722_p13 = por %p1721_p10, %p1720_p7 }
  0x2a   : > { %p1718_p6 = pneg %p1717_p5  ;;  %p1724_p1 = por %p1723_p12, %p1722_p13 }
  0x2c   : > { %p1725_p2 = pnand %p1724_p1, %p1718_p6 }
  0x2e   : > { %1728 = shalt.err (!%p1725_p2)
}
  0x2f   : > { %s1729_s21 = scalar_lea.vmem %s2031_s12, 2048  ;;  %s1892_s22 = smov [#allocation5]  }
  0x30   : > { %p1730_p3 = scmp.ne.s32.totalorder %s2031_s12, %s1729_s21  ;;  %s1734_s23 = sshll.u32 %s1892_s22, 4  ;;  %s1735_s23 = int_to_ptr.vmem [resolvable:$false] %s1734_s23 }
  0x31   : > { %s1736_s28 = scalar_lea.vmem %s1735_s23, 4096  ;;  %p1737_p9 = scmp.lt.s32.totalorder %s2031_s12, %s1735_s23 }
  0x32   : > { %p1732_p5 = pnand %p1730_p3, %p2040_p4  ;;  %p1738_p8 = scmp.lt.s32.totalorder %s1736_s28, %s1729_s21 }
  0x34   : > { %p1733_p11 = pneg %p1732_p5  ;;  %p1739_p7 = por %p1738_p8, %p1737_p9 }
  0x36   : > { %p1740_p10 = pnand %p1739_p7, %p1733_p11 }
  0x38   : > { %1743 = shalt.err (!%p1740_p10)
}
  0x39   : > { %s2510_s15 = smov 128   ;;  %s2512_s17 = smov 8  }
  0x3a   : > { %1588 = dma.hbm_to_vmem [thread:$0]  (!%p2018_p0), %s2027_s8, 2048, %s2031_s12, %s2034_s11, %s2510_s15, %s2510_s15, %s2512_s17  }
  0x3b   : > { %p2534_p8 = scmp.lt.s32.totalorder %s1890_s29, 3  ;;  %p2535_p9 = scmp.ge.s32.totalorder %s1890_s29, 1 }
  0x3c   : > { %s2079_s23 = scalar_lea.hbm %s2497_s0, %s2014_s19  ;;  %s272_s28 = scalar_lea.vmem [#allocation2], %s2011_s18 }
  0x3d   : > { %p2071_p11 = pnand %p2535_p9, %p2534_p8  ;;  %s281_s1 = sshll.u32 %s272_s28, 4  ;;  %s2082_s1 = int_to_ptr.vmem [resolvable:$true] %s281_s1 }
  0x3e   : > { %s2088_s15 = scalar_lea.hbm %s2502_s5, %s2014_s19  ;;  %s2537_s17 = sand.u32 1, %s1878_s26  }
  0x3f   : > { %s2536_s10 = scalar_select %p2071_p11, 1, 0 }
  0x40   : > { %s2092_s29 = scalar_lea.sflag [#allocation3], %s2537_s17  ;;  %s1744_s16 = scalar_lea.hbm %s2079_s23, 2048 }
  0x41   : > { %p1745_p12 = scmp.ne.s32.totalorder %s2079_s23, %s1744_s16  ;;  %s1749_s24 = scalar_lea.hbm %s2497_s0, 4096 }
  0x42   : > { %p1750_p6 = scmp.lt.u32.totalorder %s2079_s23, %s2497_s0  ;;  %p1751_p13 = scmp.lt.u32.totalorder %s1749_s24, %s1744_s16 }
  0x43   : > { %p1747_p1 = pnand %p1745_p12, %p2040_p4  ;;  %p1753_p5 = scmp.lt.u32.totalorder %s1744_s16, %s2079_s23 }
  0x44   : > { %p1752_p3 = por %p1751_p13, %p1750_p6 }
  0x45   : > { %p1748_p2 = pneg %p1747_p1 }
  0x46   : > { %p1754_p7 = por %p1753_p5, %p1752_p3 }
  0x48   : > { %p1755_p10 = pnand %p1754_p7, %p1748_p2 }
  0x4a   : > { %1758 = shalt.err (!%p1755_p10)
}
  0x4b   : > { %s1759_s19 = scalar_lea.vmem %s2082_s1, 2048  ;;  %s1895_s17 = smov [#allocation2]  }
  0x4c   : > { %p1760_p8 = scmp.ne.s32.totalorder %s2082_s1, %s1759_s19  ;;  %s1764_s8 = sshll.u32 %s1895_s17, 4  ;;  %s1765_s8 = int_to_ptr.vmem [resolvable:$false] %s1764_s8 }
  0x4d   : > { %s1766_s7 = scalar_lea.vmem %s1765_s8, 4096  ;;  %p1767_p1 = scmp.lt.s32.totalorder %s2082_s1, %s1765_s8 }
  0x4e   : > { %p1762_p9 = pnand %p1760_p8, %p2040_p4  ;;  %p1768_p11 = scmp.lt.s32.totalorder %s1766_s7, %s1759_s19 }
  0x50   : > { %p1763_p12 = pneg %p1762_p9  ;;  %p1769_p6 = por %p1768_p11, %p1767_p1 }
  0x52   : > { %p1770_p13 = pnand %p1769_p6, %p1763_p12 }
  0x54   : > { %1773 = shalt.err (!%p1770_p13)
}
  0x55   : > { %s2538_s24 = smov 8   ;;  %s2539_s16 = smov 128  }
  0x56   : > { %1585 = dma.hbm_to_vmem [thread:$0]  (!%p2018_p0), %s2079_s23, 2048, %s2082_s1, %s2092_s29, %s2539_s16, %s2539_s16, %s2538_s24  }
  0x57   : > { %s334_s12 = scalar_lea.vmem [#allocation7], %s2011_s18  ;;  %s1774_s22 = scalar_lea.hbm %s2088_s15, 2048 }
  0x58   : > { %s341_s21 = sshll.u32 %s334_s12, 4  ;;  %p1775_p11 = scmp.ne.s32.totalorder %s2088_s15, %s1774_s22  ;;  %s2120_s21 = int_to_ptr.vmem [resolvable:$true] %s341_s21 }
  0x59   : > { %s1779_s17 = scalar_lea.hbm %s2502_s5, 4096  ;;  %p1780_p5 = scmp.lt.u32.totalorder %s2088_s15, %s2502_s5 }
  0x5a   : > { %p1777_p2 = pnand %p1775_p11, %p2040_p4  ;;  %p1781_p7 = scmp.lt.u32.totalorder %s1779_s17, %s1774_s22 }
  0x5b   : > { %p1783_p8 = scmp.lt.u32.totalorder %s1774_s22, %s2088_s15 }
  0x5c   : > { %p1778_p3 = pneg %p1777_p2  ;;  %p1782_p10 = por %p1781_p7, %p1780_p5 }
  0x5e   : > { %p1784_p9 = por %p1783_p8, %p1782_p10 }
  0x60   : > { %p1785_p12 = pnand %p1784_p9, %p1778_p3 }
  0x62   : > { %1788 = shalt.err (!%p1785_p12)
}
  0x63   : > { %s1789_s1 = scalar_lea.vmem %s2120_s21, 2048  ;;  %s1896_s29 = smov [#allocation7]  }
  0x64   : > { %p1790_p1 = scmp.ne.s32.totalorder %s2120_s21, %s1789_s1  ;;  %s1794_s18 = sshll.u32 %s1896_s29, 4  ;;  %s1795_s18 = int_to_ptr.vmem [resolvable:$false] %s1794_s18 }
  0x65   : > { %s1796_s23 = scalar_lea.vmem %s1795_s18, 4096  ;;  %p1797_p11 = scmp.lt.s32.totalorder %s2120_s21, %s1795_s18 }
  0x66   : > { %p1792_p6 = pnand %p1790_p1, %p2040_p4  ;;  %p1798_p2 = scmp.lt.s32.totalorder %s1796_s23, %s1789_s1 }
  0x68   : > { %p1793_p13 = pneg %p1792_p6  ;;  %p1799_p5 = por %p1798_p2, %p1797_p11 }
  0x6a   : > { %p1800_p7 = pnand %p1799_p5, %p1793_p13 }
  0x6c   : > { %1803 = shalt.err (!%p1800_p7)
}
  0x6d   : > { %1591 = dma.hbm_to_vmem [thread:$0]  (!%p2018_p0), %s2088_s15, 2048, %s2120_s21, %s2034_s11, %s2539_s16, %s2539_s16, %s2538_s24  }
  0x6e   : > { %p2540_p4 = scmp.ne.s32.totalorder %s2536_s10, 0 }
  0x6f   : > { %s2150_s9 = sand.u32 (!%p2540_p4), 1, %s1874_s25   ;;  %p2541_p3 = scmp.ne.s32.totalorder (!%p2540_p4), %s2526_s13, 0 }
  0x70   : > { %359 = sbr.rel (%p2540_p4) target bundleno = 963 (0x3c3), region = 48  ;;  %s2153_s12 = sshll.u32 (!%p2540_p4), %s2150_s9, 7 }
  0x71   : > { %s362_s20 = scalar_lea.sflag (!%p2540_p4), [#allocation3], %s2150_s9  ;;  %s2157_s22 = scalar_lea.vmem (!%p2540_p4), [#allocation2], %s2153_s12 }
  0x77   : > { %1857 = dma.done.wait (%p2541_p3), %s362_s20, 2048  }
  0x78   : > { %1859 = vsyncadd (%p2541_p3), %s362_s20, 4294965248  ;;  %s370_s11 = sand.u32 1, %s1971_s30   ;;  %s2165_s10 = scalar_lea.vmem [#allocation5], %s2153_s12 }
  0x79   : > { %s371_s15 = scalar_lea.sflag [#allocation6], %s370_s11 }
  0x7a   : > { %1861 = dma.done.wait (%p2541_p3), %s371_s15, 4096  }
  0x7b   : > { %1863 = vsyncadd (%p2541_p3), %s371_s15, 4294963200  ;;  %v466_v0 = vld [vmem:[%s2165_s10] sm:$0xff]  ;;  %v467_v1 = vld [vmem:[%s2165_s10 + $0x8] sm:$0xff]  ;;  %p437_p0 = scmp.lt.s32.totalorder %s1882_s27, 1  ;;  %s2289_s21 = scalar_lea.vmem [#allocation7], %s2153_s12 }
  0x7c   : > { %v468_v2 = vld [vmem:[%s2165_s10 + $0x10] sm:$0xff]  ;;  %v1510_v3 = vpack.c.bf16 %v467_v1, %v466_v0  ;;  %v469_v4 = vld [vmem:[%s2165_s10 + $0x18] sm:$0xff]  ;;  %v470_v6 = vld [vmem:[%s2165_s10 + $0x20] sm:$0xff]  ;;  %s2423_s20 = scalar_lea.vmem [#allocation8], %s2153_s12  ;;  %s1333_s12 = sshll.u32 %s1882_s27, 11 }
  0x7d   : > { %v1514_v5 = vpack.c.bf16 %v469_v4, %v468_v2  ;;  %v471_v7 = vld [vmem:[%s2165_s10 + $0x28] sm:$0xff]  ;;  %v450_v9 = vld [vmem:[%s2157_s22] sm:$0xff]  ;;  %v472_v10 = vld [vmem:[%s2165_s10 + $0x30] sm:$0xff]  ;;  %s2205_s30 = scalar_select %p437_p0, %s1882_s27, 1 }
  0x7e   : > { %1511 = vmatprep.subr.bf16.mxu0 %v1510_v3  ;;  %v1518_v8 = vpack.c.bf16 %v471_v7, %v470_v6  ;;  %v473_v11 = vld [vmem:[%s2165_s10 + $0x38] sm:$0xff]  ;;  %1430 = vmatprep.mubr.f32.mxu0 %v450_v9  ;;  %v474_v13 = vld [vmem:[%s2165_s10 + $0x40] sm:$0xff]  ;;  %v475_v14 = vld [vmem:[%s2165_s10 + $0x48] sm:$0xff]  ;;  %s1122_s27 = scalar_lea.sflag [#allocation4], %s2150_s9  ;;  %p2543_p8 = scmp.ne.s32.totalorder %s2527_s14, 0 }
  0x7f   : > { %1513 = vmatpush3.bf16.msra.mxu0 %v1510_v3  ;;  %v1522_v12 = vpack.c.bf16 %v473_v11, %v472_v10  ;;  %v1526_v15 = vpack.c.bf16 %v475_v14, %v474_v13  ;;  %v476_v16 = vld [vmem:[%s2165_s10 + $0x50] sm:$0xff]  ;;  %v477_v17 = vld [vmem:[%s2165_s10 + $0x58] sm:$0xff]  ;;  %v478_v19 = vld [vmem:[%s2165_s10 + $0x60] sm:$0xff]  ;;  %s439_s16 = scalar_lea.vmem %s2499_s2, %s2205_s30  ;;  %s442_s17 = scalar_lea.vmem %s2500_s3, %s2205_s30 }
  0x80   : > { %1515 = vmatprep.subr.bf16.mxu0 %v1514_v5  ;;  %v1530_v18 = vpack.c.bf16 %v477_v17, %v476_v16  ;;  %v479_v20 = vld [vmem:[%s2165_s10 + $0x68] sm:$0xff]  ;;  %v480_v22 = vld [vmem:[%s2165_s10 + $0x70] sm:$0xff]  ;;  %v481_v23 = vld [vmem:[%s2165_s10 + $0x78] sm:$0xff]  ;;  %s445_s1 = scalar_lea.vmem %s2501_s4, %s2205_s30  ;;  %s448_s23 = scalar_lea.vmem %s2503_s6, %s2205_s30 }
  0x81   : > { %v1534_v21 = vpack.c.bf16 %v479_v20, %v478_v19  ;;  %v1538_v24 = vpack.c.bf16 %v481_v23, %v480_v22  ;;  %v451_v25 = vld [vmem:[%s2157_s22 + $0x8] sm:$0xff]  ;;  %v452_v26 = vld [vmem:[%s2157_s22 + $0x10] sm:$0xff]  ;;  %v453_v27 = vld [vmem:[%s2157_s22 + $0x18] sm:$0xff]  ;;  %s2542_s10 = sld [smem:[#allocation19_spill]]  ;;  %s1897_s24 = smov [#allocation8]  }
  0x82   : > { %v454_v28 = vld [vmem:[%s2157_s22 + $0x20] sm:$0xff]  ;;  %v455_v29 = vld [vmem:[%s2157_s22 + $0x28] sm:$0xff]  ;;  %v456_v30 = vld [vmem:[%s2157_s22 + $0x30] sm:$0xff] }
  0x83   : > { %1517 = vmatpush3.bf16.msra.mxu0 %v1514_v5  ;;  %v457_v31 = vld [vmem:[%s2157_s22 + $0x38] sm:$0xff]  ;;  %v458_v32 = vld [vmem:[%s2157_s22 + $0x40] sm:$0xff]  ;;  %v459_v33 = vld [vmem:[%s2157_s22 + $0x48] sm:$0xff] }
  0x84   : > { %1519 = vmatprep.subr.bf16.mxu0 %v1518_v8  ;;  %v460_v34 = vld [vmem:[%s2157_s22 + $0x50] sm:$0xff]  ;;  %v461_v35 = vld [vmem:[%s2157_s22 + $0x58] sm:$0xff]  ;;  %v462_v36 = vld [vmem:[%s2157_s22 + $0x60] sm:$0xff] }
  0x85   : > { %v463_v37 = vld [vmem:[%s2157_s22 + $0x68] sm:$0xff]  ;;  %v464_v38 = vld [vmem:[%s2157_s22 + $0x70] sm:$0xff]  ;;  %v465_v39 = vld [vmem:[%s2157_s22 + $0x78] sm:$0xff]  ;;  %s1137_s22 = sshll.u32 %s2423_s20, 4  ;;  %s2446_s22 = int_to_ptr.vmem [resolvable:$true] %s1137_s22 }
  0x86   : > { %v1321_v40 = vld [vmem:[%s439_s16] ss:$0 sm:$0xff]  ;;  %s1804_s13 = scalar_lea.vmem %s2446_s22, 2048  ;;  %s1808_s16 = sshll.u32 %s1897_s24, 4  ;;  %s1809_s16 = int_to_ptr.vmem [resolvable:$false] %s1808_s16 }
  0x87   : > { %1521 = vmatpush3.bf16.msra.mxu0 %v1518_v8  ;;  %s2444_s30 = scalar_lea.hbm %s2542_s10, %s1333_s12  ;;  %p1805_p10 = scmp.ne.s32.totalorder %s2446_s22, %s1804_s13 }
  0x88   : > { %1523 = vmatprep.subr.bf16.mxu0 %v1522_v12  ;;  %p1811_p1 = scmp.lt.s32.totalorder %s2446_s22, %s1809_s16 }
  0x89   : > { %p1806_p9 = pnand %p1805_p10, %p2543_p8 }
  0x8b   : > { %1525 = vmatpush3.bf16.msra.mxu0 %v1522_v12  ;;  %p1807_p12 = pneg %p1806_p9 }
  0x8c   : > { %1527 = vmatprep.subr.bf16.mxu0 %v1526_v15 }
  0x8f   : > { %1529 = vmatpush3.bf16.msra.mxu0 %v1526_v15 }
  0x90   : > { %1531 = vmatprep.subr.bf16.mxu0 %v1530_v18 }
  0x93   : > { %1533 = vmatpush3.bf16.msra.mxu0 %v1530_v18 }
  0x94   : > { %1535 = vmatprep.subr.bf16.mxu0 %v1534_v21 }
  0x97   : > { %1537 = vmatpush3.bf16.msra.mxu0 %v1534_v21 }
  0x98   : > { %1539 = vmatprep.subr.bf16.mxu0 %v1538_v24 }
  0x9b   : > { %1541 = vmatpush3.bf16.msra.mxu0 %v1538_v24 }
  0x9e   : > { %1431 = vmatmul.mubr.f32.vlgmr.msra.gmra.mrb[0].mxu0 %v451_v25 }
  0x9f   : > { %1433 = vmatprep.mubr.f32.mxu0 %v452_v26 }
  0xa2   : > { %1434 = vmatmul.mubr.f32.gmra.mrb[2].mxu0 %v453_v27 }
  0xa3   : > { %1436 = vmatprep.mubr.f32.mxu0 %v454_v28 }
  0xa6   : > { %1437 = vmatmul.mubr.f32.gmra.mrb[4].mxu0 %v455_v29 }
  0xa7   : > { %1439 = vmatprep.mubr.f32.mxu0 %v456_v30 }
  0xaa   : > { %1440 = vmatmul.mubr.f32.gmra.mrb[6].mxu0 %v457_v31 }
  0xab   : > { %1442 = vmatprep.mubr.f32.mxu0 %v458_v32 }
  0xae   : > { %1443 = vmatmul.mubr.f32.gmra.mrb[8].mxu0 %v459_v33 }
  0xaf   : > { %1445 = vmatprep.mubr.f32.mxu0 %v460_v34 }
  0xb2   : > { %1446 = vmatmul.mubr.f32.gmra.mrb[10].mxu0 %v461_v35 }
  0xb3   : > { %1448 = vmatprep.mubr.f32.mxu0 %v462_v36 }
  0xb6   : > { %1449 = vmatmul.mubr.f32.gmra.mrb[12].mxu0 %v463_v37 }
  0xb7   : > { %1451 = vmatprep.mubr.f32.mxu0 %v464_v38 }
  0xba   : > { %1452 = vmatmul.mubr.f32.gmra.mrb[14].mxu0 %v465_v39 }
 0x171   : > { %v1432_v41 = vpop.f32.mrb[0].mxu0 }
 0x172   : > { %v555_v42 = vpop.f32.mrb[1].mxu0  ;;  %v561_v46 = vadd.f32 %v1432_v41, %v1321_v40 }
 0x173   : > { %v556_v43 = vadd.f32 %v1321_v40, %v555_v42 }
 0x175   : > { %v1435_v44 = vpop.f32.mrb[2].mxu0  ;;  %634 = vadd.xlane.f32.xlu0 %v556_v43 }
 0x176   : > { %v565_v45 = vpop.f32.mrb[3].mxu0  ;;  %v571_v50 = vadd.f32 %v1435_v44, %v1321_v40 }
 0x177   : > { %v566_v47 = vadd.f32 %v1321_v40, %v565_v45 }
 0x179   : > { %v1438_v48 = vpop.f32.mrb[4].mxu0  ;;  %638 = vadd.xlane.f32.xlu1 %v566_v47  ;;  %636 = vadd.xlane.f32.xlu0 %v561_v46 }
 0x17a   : > { %v575_v49 = vpop.f32.mrb[5].mxu0  ;;  %v581_v54 = vadd.f32 %v1438_v48, %v1321_v40 }
 0x17b   : > { %v576_v51 = vadd.f32 %v1321_v40, %v575_v49 }
 0x17d   : > { %v1441_v52 = vpop.f32.mrb[6].mxu0  ;;  %640 = vadd.xlane.f32.xlu1 %v571_v50  ;;  %642 = vadd.xlane.f32.xlu0 %v576_v51 }
 0x17e   : > { %v585_v53 = vpop.f32.mrb[7].mxu0  ;;  %v591_v58 = vadd.f32 %v1441_v52, %v1321_v40 }
 0x17f   : > { %v586_v55 = vadd.f32 %v1321_v40, %v585_v53 }
 0x181   : > { %v1444_v56 = vpop.f32.mrb[8].mxu0  ;;  %644 = vadd.xlane.f32.xlu1 %v581_v54  ;;  %646 = vadd.xlane.f32.xlu0 %v586_v55 }
 0x182   : > { %v595_v57 = vpop.f32.mrb[9].mxu0  ;;  %v2211_v62 = vadd.f32 %v1444_v56, %v1321_v40 }
 0x183   : > { %v596_v59 = vadd.f32 %v1321_v40, %v595_v57 }
 0x185   : > { %v1447_v60 = vpop.f32.mrb[10].mxu0  ;;  %648 = vadd.xlane.f32.xlu1 %v591_v58  ;;  %650 = vadd.xlane.f32.xlu0 %v596_v59 }
 0x186   : > { %v605_v61 = vpop.f32.mrb[11].mxu0  ;;  %v2217_v2 = vadd.f32 %v1447_v60, %v1321_v40 }
 0x187   : > { %v2213_v63 = vadd.f32 %v1321_v40, %v605_v61 }
 0x189   : > { %v1450_v0 = vpop.f32.mrb[12].mxu0  ;;  %652 = vadd.xlane.f32.xlu1 %v2211_v62  ;;  %654 = vadd.xlane.f32.xlu0 %v2213_v63 }
 0x18a   : > { %v615_v1 = vpop.f32.mrb[13].mxu0  ;;  %v2223_v6 = vadd.f32 %v1450_v0, %v1321_v40 }
 0x18b   : > { %v2219_v3 = vadd.f32 %v1321_v40, %v615_v1  ;;  %v937_v1 = vld [vmem:[%s2289_s21] sm:$0xff] }
 0x18d   : > { %v1453_v4 = vpop.f32.mrb[14].mxu0  ;;  %656 = vadd.xlane.f32.xlu1 %v2217_v2  ;;  %658 = vadd.xlane.f32.xlu0 %v2219_v3 }
 0x18e   : > { %v625_v5 = vpop.f32.mrb[15].mxu0  ;;  %v2229_v8 = vadd.f32 %v1453_v4, %v1321_v40 }
 0x18f   : > { %v2225_v7 = vadd.f32 %v1321_v40, %v625_v5 }
 0x191   : > { %660 = vadd.xlane.f32.xlu1 %v2223_v6  ;;  %662 = vadd.xlane.f32.xlu0 %v2225_v7 }
 0x195   : > { %664 = vadd.xlane.f32.xlu1 %v2229_v8 }
 0x202   : > { %v635_v9 = vpop.xlane.xlu0 %634 }
 0x203   : > { %v667_v10 = vmul.f32 0.0078125, %v635_v9 }
 0x205   : > { %v2232_v11 = vsub.f32 %v556_v43, %v667_v10 }
 0x206   : > { %v639_v12 = vpop.xlane.xlu1 %638  ;;  %v637_v13 = vpop.xlane.xlu0 %636 }
 0x207   : > { %v669_v14 = vmul.f32 0.0078125, %v639_v12  ;;  %v668_v15 = vmul.f32 0.0078125, %v637_v13  ;;  %v699_v16 = vmul.f32 %v2232_v11, %v2232_v11 }
 0x209   : > { %v2236_v17 = vsub.f32 %v566_v47, %v669_v14  ;;  %v2238_v18 = vsub.f32 %v561_v46, %v668_v15  ;;  %715 = vadd.xlane.f32.xlu0 %v699_v16  ;;  %v940_v14 = vld [vmem:[%s2289_s21 + $0x18] sm:$0xff] }
 0x20a   : > { %v641_v19 = vpop.xlane.xlu1 %640  ;;  %v643_v20 = vpop.xlane.xlu0 %642 }
 0x20b   : > { %v670_v21 = vmul.f32 0.0078125, %v641_v19  ;;  %v671_v22 = vmul.f32 0.0078125, %v643_v20  ;;  %v701_v23 = vmul.f32 %v2236_v17, %v2236_v17  ;;  %v700_v24 = vmul.f32 %v2238_v18, %v2238_v18  ;;  %v941_v19 = vld [vmem:[%s2289_s21 + $0x20] sm:$0xff]  ;;  %v942_v20 = vld [vmem:[%s2289_s21 + $0x28] sm:$0xff] }
 0x20d   : > { %v2244_v25 = vsub.f32 %v571_v50, %v670_v21  ;;  %v2246_v26 = vsub.f32 %v576_v51, %v671_v22  ;;  %719 = vadd.xlane.f32.xlu0 %v701_v23  ;;  %717 = vadd.xlane.f32.xlu1 %v700_v24  ;;  %v1550_v21 = vpack.c.bf16 %v942_v20, %v941_v19  ;;  %v944_v22 = vld [vmem:[%s2289_s21 + $0x38] sm:$0xff]  ;;  %v945_v24 = vld [vmem:[%s2289_s21 + $0x40] sm:$0xff] }
 0x20e   : > { %v645_v27 = vpop.xlane.xlu1 %644  ;;  %v647_v28 = vpop.xlane.xlu0 %646 }
 0x20f   : > { %v672_v29 = vmul.f32 0.0078125, %v645_v27  ;;  %v673_v30 = vmul.f32 0.0078125, %v647_v28  ;;  %v702_v31 = vmul.f32 %v2244_v25, %v2244_v25  ;;  %v703_v32 = vmul.f32 %v2246_v26, %v2246_v26  ;;  %v946_v27 = vld [vmem:[%s2289_s21 + $0x48] sm:$0xff] }
 0x210   : > { %v1558_v28 = vpack.c.bf16 %v946_v27, %v945_v24 }
 0x211   : > { %v2252_v33 = vsub.f32 %v581_v54, %v672_v29  ;;  %v2254_v34 = vsub.f32 %v586_v55, %v673_v30  ;;  %721 = vadd.xlane.f32.xlu1 %v702_v31  ;;  %723 = vadd.xlane.f32.xlu0 %v703_v32  ;;  %v947_v29 = vld [vmem:[%s2289_s21 + $0x50] sm:$0xff]  ;;  %v948_v30 = vld [vmem:[%s2289_s21 + $0x58] sm:$0xff]  ;;  %v949_v32 = vld [vmem:[%s2289_s21 + $0x60] sm:$0xff] }
 0x212   : > { %v649_v35 = vpop.xlane.xlu1 %648  ;;  %v651_v36 = vpop.xlane.xlu0 %650  ;;  %v1562_v31 = vpack.c.bf16 %v948_v30, %v947_v29 }
 0x213   : > { %v674_v37 = vmul.f32 0.0078125, %v649_v35  ;;  %v675_v38 = vmul.f32 0.0078125, %v651_v36  ;;  %v704_v39 = vmul.f32 %v2252_v33, %v2252_v33  ;;  %v705_v40 = vmul.f32 %v2254_v34, %v2254_v34  ;;  %v950_v35 = vld [vmem:[%s2289_s21 + $0x68] sm:$0xff] }
 0x214   : > { %v1566_v36 = vpack.c.bf16 %v950_v35, %v949_v32 }
 0x215   : > { %v2260_v41 = vsub.f32 %v591_v58, %v674_v37  ;;  %v2262_v42 = vsub.f32 %v596_v59, %v675_v38  ;;  %725 = vadd.xlane.f32.xlu1 %v704_v39  ;;  %727 = vadd.xlane.f32.xlu0 %v705_v40  ;;  %v951_v37 = vld [vmem:[%s2289_s21 + $0x70] sm:$0xff]  ;;  %v952_v38 = vld [vmem:[%s2289_s21 + $0x78] sm:$0xff] }
 0x216   : > { %v653_v43 = vpop.xlane.xlu1 %652  ;;  %v655_v44 = vpop.xlane.xlu0 %654  ;;  %v1570_v39 = vpack.c.bf16 %v952_v38, %v951_v37 }
 0x217   : > { %v676_v45 = vmul.f32 0.0078125, %v653_v43  ;;  %v677_v46 = vmul.f32 0.0078125, %v655_v44  ;;  %v706_v47 = vmul.f32 %v2260_v41, %v2260_v41  ;;  %v707_v48 = vmul.f32 %v2262_v42, %v2262_v42 }
 0x219   : > { %v2269_v49 = vsub.f32 %v2211_v62, %v676_v45  ;;  %v2272_v50 = vsub.f32 %v2213_v63, %v677_v46  ;;  %729 = vadd.xlane.f32.xlu1 %v706_v47  ;;  %731 = vadd.xlane.f32.xlu0 %v707_v48 }
 0x21a   : > { %v657_v51 = vpop.xlane.xlu1 %656  ;;  %v659_v52 = vpop.xlane.xlu0 %658 }
 0x21b   : > { %v678_v53 = vmul.f32 0.0078125, %v657_v51  ;;  %v679_v54 = vmul.f32 0.0078125, %v659_v52  ;;  %v708_v55 = vmul.f32 %v2269_v49, %v2269_v49  ;;  %v709_v56 = vmul.f32 %v2272_v50, %v2272_v50 }
 0x21d   : > { %v2279_v57 = vsub.f32 %v2217_v2, %v678_v53  ;;  %v2282_v58 = vsub.f32 %v2219_v3, %v679_v54  ;;  %733 = vadd.xlane.f32.xlu1 %v708_v55  ;;  %735 = vadd.xlane.f32.xlu0 %v709_v56  ;;  %v938_v2 = vld [vmem:[%s2289_s21 + $0x8] sm:$0xff] }
 0x21e   : > { %v661_v59 = vpop.xlane.xlu1 %660  ;;  %v663_v60 = vpop.xlane.xlu0 %662  ;;  %v1542_v3 = vpack.c.bf16 %v938_v2, %v937_v1 }
 0x21f   : > { %v680_v61 = vmul.f32 0.0078125, %v661_v59  ;;  %v681_v62 = vmul.f32 0.0078125, %v663_v60  ;;  %v710_v63 = vmul.f32 %v2279_v57, %v2279_v57  ;;  %v711_v0 = vmul.f32 %v2282_v58, %v2282_v58 }
 0x220   : > { %1543 = vmatprep.subr.bf16.mxu1 %v1542_v3 }
 0x221   : > { %v2294_v4 = vsub.f32 %v2223_v6, %v680_v61  ;;  %v2297_v5 = vsub.f32 %v2225_v7, %v681_v62  ;;  %737 = vadd.xlane.f32.xlu1 %v710_v63  ;;  %739 = vadd.xlane.f32.xlu0 %v711_v0  ;;  %v939_v6 = vld [vmem:[%s2289_s21 + $0x10] sm:$0xff] }
 0x222   : > { %v665_v9 = vpop.xlane.xlu1 %664  ;;  %1545 = vmatpush3.bf16.msra.mxu1 %v1542_v3  ;;  %v1546_v7 = vpack.c.bf16 %v940_v14, %v939_v6 }
 0x223   : > { %v682_v10 = vmul.f32 0.0078125, %v665_v9  ;;  %v712_v12 = vmul.f32 %v2294_v4, %v2294_v4  ;;  %v713_v13 = vmul.f32 %v2297_v5, %v2297_v5  ;;  %v2330_v9 = vld [vmem:[%s442_s17] ss:$0 sm:$0xff] }
 0x224   : > { %1547 = vmatprep.subr.bf16.mxu1 %v1546_v7 }
 0x225   : > { %v2306_v15 = vsub.f32 %v2229_v8, %v682_v10  ;;  %741 = vadd.xlane.f32.xlu1 %v712_v12  ;;  %743 = vadd.xlane.f32.xlu0 %v713_v13  ;;  %v943_v8 = vld [vmem:[%s2289_s21 + $0x30] sm:$0xff]  ;;  %s1810_s21 = scalar_lea.vmem %s1809_s16, 4096 }
 0x226   : > { %1549 = vmatpush3.bf16.msra.mxu1 %v1546_v7  ;;  %v1554_v23 = vpack.c.bf16 %v944_v22, %v943_v8  ;;  %v2333_v7 = vld [vmem:[%s445_s1] ss:$0 sm:$0xff]  ;;  %p1812_p6 = scmp.lt.s32.totalorder %s1810_s21, %s1804_s13 }
 0x227   : > { %v714_v16 = vmul.f32 %v2306_v15, %v2306_v15  ;;  %1551 = vmatprep.subr.bf16.mxu1 %v1550_v21 }
 0x228   : > { %p1813_p13 = por %p1812_p6, %p1811_p1 }
 0x229   : > { %745 = vadd.xlane.f32.xlu1 %v714_v16 }
 0x22a   : > { %1553 = vmatpush3.bf16.msra.mxu1 %v1550_v21  ;;  %p1814_p11 = pnand %p1813_p13, %p1807_p12 }
 0x22b   : > { %1555 = vmatprep.subr.bf16.mxu1 %v1554_v23 }
 0x22e   : > { %1557 = vmatpush3.bf16.msra.mxu1 %v1554_v23 }
 0x22f   : > { %1559 = vmatprep.subr.bf16.mxu1 %v1558_v28 }
 0x232   : > { %1561 = vmatpush3.bf16.msra.mxu1 %v1558_v28 }
 0x233   : > { %1563 = vmatprep.subr.bf16.mxu1 %v1562_v31 }
 0x236   : > { %1565 = vmatpush3.bf16.msra.mxu1 %v1562_v31 }
 0x237   : > { %1567 = vmatprep.subr.bf16.mxu1 %v1566_v36 }
 0x23a   : > { %1569 = vmatpush3.bf16.msra.mxu1 %v1566_v36 }
 0x23b   : > { %1571 = vmatprep.subr.bf16.mxu1 %v1570_v39 }
 0x23e   : > { %1573 = vmatpush3.bf16.msra.mxu1 %v1570_v39 }
 0x296   : > { %v716_v40 = vpop.xlane.xlu0 %715 }
 0x297   : > { %v747_v43 = vmul.f32 0.0078125, %v716_v40 }
 0x299   : > { %v763_v44 = vadd.f32 1e-05, %v747_v43 }
 0x29a   : > { %v718_v45 = vpop.xlane.xlu1 %717  ;;  %v720_v46 = vpop.xlane.xlu0 %719 }
 0x29b   : > { %1650 = vrsqrt.f32 %v763_v44  ;;  %v748_v47 = vmul.f32 0.0078125, %v718_v45  ;;  %v749_v48 = vmul.f32 0.0078125, %v720_v46 }
 0x29d   : > { %v764_v51 = vadd.f32 1e-05, %v748_v47  ;;  %v765_v52 = vadd.f32 1e-05, %v749_v48 }
 0x29e   : > { %v722_v53 = vpop.xlane.xlu1 %721  ;;  %v724_v54 = vpop.xlane.xlu0 %723 }
 0x29f   : > { %1652 = vrsqrt.f32 %v764_v51  ;;  %v750_v55 = vmul.f32 0.0078125, %v722_v53  ;;  %v751_v56 = vmul.f32 0.0078125, %v724_v54 }
 0x2a0   : > { %1654 = vrsqrt.f32 %v765_v52 }
 0x2a1   : > { %v766_v59 = vadd.f32 1e-05, %v750_v55  ;;  %v767_v60 = vadd.f32 1e-05, %v751_v56 }
 0x2a2   : > { %v726_v61 = vpop.xlane.xlu1 %725  ;;  %v728_v62 = vpop.xlane.xlu0 %727 }
 0x2a3   : > { %1656 = vrsqrt.f32 %v766_v59  ;;  %v752_v63 = vmul.f32 0.0078125, %v726_v61  ;;  %v753_v0 = vmul.f32 0.0078125, %v728_v62 }
 0x2a4   : > { %1658 = vrsqrt.f32 %v767_v60 }
 0x2a5   : > { %v1651_v1 = vpop.eup %1650  ;;  %v768_v2 = vadd.f32 1e-05, %v752_v63  ;;  %v769_v3 = vadd.f32 1e-05, %v753_v0 }
 0x2a6   : > { %v730_v10 = vpop.xlane.xlu1 %729  ;;  %v732_v12 = vpop.xlane.xlu0 %731  ;;  %v795_v13 = vmul.f32 %v1651_v1, %v2232_v11 }
 0x2a7   : > { %1660 = vrsqrt.f32 %v768_v2  ;;  %v754_v6 = vmul.f32 0.0078125, %v730_v10  ;;  %v755_v14 = vmul.f32 0.0078125, %v732_v12 }
 0x2a8   : > { %v818_v16 = vmul.f32 %v2330_v9, %v795_v13  ;;  %1662 = vrsqrt.f32 %v769_v3 }
 0x2a9   : > { %v1653_v19 = vpop.eup %1652  ;;  %v770_v20 = vadd.f32 1e-05, %v754_v6  ;;  %v771_v21 = vadd.f32 1e-05, %v755_v14 }
 0x2aa   : > { %v1655_v8 = vpop.eup %1654  ;;  %v734_v22 = vpop.xlane.xlu1 %733  ;;  %v841_v24 = vadd.f32 %v2333_v7, %v818_v16  ;;  %v796_v27 = vmul.f32 %v1653_v19, %v2238_v18 }
 0x2ab   : > { %v736_v23 = vpop.xlane.xlu0 %735  ;;  %1664 = vrsqrt.f32 %v770_v20  ;;  %v756_v11 = vmul.f32 0.0078125, %v734_v22  ;;  %v797_v29 = vmul.f32 %v1655_v8, %v2236_v17 }
 0x2ac   : > { %v757_v28 = vmul.f32 0.0078125, %v736_v23  ;;  %v873_v30 = vmul.f32 0.70710677, %v841_v24  ;;  %v819_v31 = vmul.f32 %v2330_v9, %v796_v27  ;;  %1666 = vrsqrt.f32 %v771_v21 }
 0x2ad   : > { %v1657_v32 = vpop.eup %1656  ;;  %v772_v35 = vadd.f32 1e-05, %v756_v11  ;;  %v820_v37 = vmul.f32 %v2330_v9, %v797_v29  ;;  %v857_v21 = vmul.f32 0.5, %v841_v24 }
 0x2ae   : > { %v773_v36 = vadd.f32 1e-05, %v757_v28  ;;  %v1659_v38 = vpop.eup %1658  ;;  %v738_v39 = vpop.xlane.xlu1 %737  ;;  %1668 = verf.f32 %v873_v30  ;;  %v2342_v18 = vadd.f32 %v2333_v7, %v819_v31  ;;  %v798_v43 = vmul.f32 %v1657_v32, %v2244_v25 }
 0x2af   : > { %v740_v40 = vpop.xlane.xlu0 %739  ;;  %1670 = vrsqrt.f32 %v772_v35  ;;  %v758_v17 = vmul.f32 0.0078125, %v738_v39  ;;  %v2346_v45 = vadd.f32 %v2333_v7, %v820_v37  ;;  %v799_v53 = vmul.f32 %v1659_v38, %v2246_v26 }
 0x2b0   : > { %v759_v44 = vmul.f32 0.0078125, %v740_v40  ;;  %1672 = vrsqrt.f32 %v773_v36  ;;  %v874_v46 = vmul.f32 0.70710677, %v2342_v18  ;;  %v821_v47 = vmul.f32 %v2330_v9, %v798_v43 }
 0x2b1   : > { %v1661_v48 = vpop.eup %1660  ;;  %v774_v51 = vadd.f32 1e-05, %v758_v17  ;;  %v875_v25 = vmul.f32 0.70710677, %v2346_v45  ;;  %v822_v63 = vmul.f32 %v2330_v9, %v799_v53  ;;  %v859_v53 = vmul.f32 0.5, %v2346_v45 }
 0x2b2   : > { %v775_v52 = vadd.f32 1e-05, %v759_v44  ;;  %v742_v54 = vpop.xlane.xlu1 %741  ;;  %1674 = verf.f32 %v874_v46  ;;  %v2353_v56 = vadd.f32 %v2333_v7, %v821_v47  ;;  %v800_v59 = vmul.f32 %v1661_v48, %v2252_v33  ;;  %v1663_v60 = vpop.eup %1662 }
 0x2b3   : > { %v744_v55 = vpop.xlane.xlu0 %743  ;;  %1676 = vrsqrt.f32 %v774_v51  ;;  %v760_v61 = vmul.f32 0.0078125, %v742_v54  ;;  %v845_v10 = vadd.f32 %v2333_v7, %v822_v63  ;;  %v801_v13 = vmul.f32 %v1663_v60, %v2254_v34 }
 0x2b4   : > { %v761_v62 = vmul.f32 0.0078125, %v744_v55  ;;  %1678 = vrsqrt.f32 %v775_v52  ;;  %v876_v0 = vmul.f32 0.70710677, %v2353_v56  ;;  %v823_v26 = vmul.f32 %v2330_v9, %v800_v59 }
 0x2b5   : > { %v1665_v1 = vpop.eup %1664  ;;  %v776_v2 = vadd.f32 1e-05, %v760_v61  ;;  %1680 = verf.f32 %v875_v25  ;;  %v877_v19 = vmul.f32 0.70710677, %v845_v10  ;;  %v824_v22 = vmul.f32 %v2330_v9, %v801_v13 }
 0x2b6   : > { %v777_v3 = vadd.f32 1e-05, %v761_v62  ;;  %v746_v12 = vpop.xlane.xlu1 %745  ;;  %1682 = verf.f32 %v876_v0  ;;  %v2361_v33 = vadd.f32 %v2333_v7, %v823_v26  ;;  %v802_v6 = vmul.f32 %v1665_v1, %v2260_v41  ;;  %v1667_v14 = vpop.eup %1666 }
 0x2b7   : > { %1684 = vrsqrt.f32 %v776_v2  ;;  %v762_v16 = vmul.f32 0.0078125, %v746_v12  ;;  %v2369_v41 = vadd.f32 %v2333_v7, %v824_v22  ;;  %v803_v29 = vmul.f32 %v1667_v14, %v2262_v42 }
 0x2b8   : > { %v1669_v20 = vpop.eup %1668  ;;  %1686 = vrsqrt.f32 %v777_v3  ;;  %v878_v8 = vmul.f32 0.70710677, %v2361_v33  ;;  %v825_v28 = vmul.f32 %v2330_v9, %v802_v6  ;;  %v858_v42 = vmul.f32 0.5, %v2342_v18 }
 0x2b9   : > { %v1671_v23 = vpop.eup %1670  ;;  %v778_v27 = vadd.f32 1e-05, %v762_v16  ;;  %v905_v11 = vadd.f32 1.0, %v1669_v20  ;;  %1688 = verf.f32 %v877_v19  ;;  %v879_v36 = vmul.f32 0.70710677, %v2369_v41 }
 0x2ba   : > { %v1673_v34 = vpop.eup %1672  ;;  %1690 = verf.f32 %v878_v8  ;;  %v804_v30 = vmul.f32 %v1671_v23, %v2269_v49  ;;  %v2374_v31 = vadd.f32 %v2333_v7, %v825_v28  ;;  %v826_v37 = vmul.f32 %v2330_v9, %v803_v29 }
 0x2bb   : > { %1692 = vrsqrt.f32 %v778_v27  ;;  %v921_v24 = vmul.f32 %v905_v11, %v857_v21  ;;  %v805_v32 = vmul.f32 %v1673_v34, %v2272_v50  ;;  %v860_v55 = vmul.f32 0.5, %v2353_v56 }
 0x2bc   : > { %v1675_v35 = vpop.eup %1674  ;;  %v827_v38 = vmul.f32 %v2330_v9, %v804_v30  ;;  %v880_v49 = vmul.f32 0.70710677, %v2374_v31  ;;  %1694 = verf.f32 %v879_v36  ;;  %v2384_v50 = vadd.f32 %v2333_v7, %v826_v37 }
 0x2bd   : > { %v1677_v39 = vpop.eup %1676  ;;  %1486 = vmatprep.mubr.f32.mxu1 %v921_v24  ;;  %v906_v40 = vadd.f32 1.0, %v1675_v35  ;;  %v828_v43 = vmul.f32 %v2330_v9, %v805_v32  ;;  %v862_v14 = vmul.f32 0.5, %v2361_v33  ;;  %v863_v34 = vmul.f32 0.5, %v2369_v41 }
 0x2be   : > { %v1679_v17 = vpop.eup %1678  ;;  %v2387_v44 = vadd.f32 %v2333_v7, %v827_v38  ;;  %v806_v46 = vmul.f32 %v1677_v39, %v2279_v57  ;;  %1696 = verf.f32 %v880_v49  ;;  %v881_v25 = vmul.f32 0.70710677, %v2384_v50 }
 0x2bf   : > { %v1681_v47 = vpop.eup %1680  ;;  %v922_v48 = vmul.f32 %v906_v40, %v858_v42  ;;  %v2391_v18 = vadd.f32 %v2333_v7, %v828_v43  ;;  %v807_v51 = vmul.f32 %v1679_v17, %v2282_v58  ;;  %v861_v57 = vmul.f32 0.5, %v845_v10 }
 0x2c0   : > { %v1683_v52 = vpop.eup %1682  ;;  %v907_v54 = vadd.f32 1.0, %v1681_v47  ;;  %v882_v61 = vmul.f32 0.70710677, %v2387_v44  ;;  %1698 = verf.f32 %v881_v25  ;;  %v829_v58 = vmul.f32 %v2330_v9, %v806_v46 }
 0x2c1   : > { %v1685_v59 = vpop.eup %1684  ;;  %1487 = vmatmul.mubr.f32.vlgmr.msra.gmra.mrb[0].mxu1 %v922_v48  ;;  %v908_v60 = vadd.f32 1.0, %v1683_v52  ;;  %v883_v62 = vmul.f32 0.70710677, %v2391_v18  ;;  %v830_v45 = vmul.f32 %v2330_v9, %v807_v51  ;;  %v864_v30 = vmul.f32 0.5, %v2374_v31 }
 0x2c2   : > { %v1687_v63 = vpop.eup %1686  ;;  %v923_v0 = vmul.f32 %v907_v54, %v859_v53  ;;  %1700 = verf.f32 %v882_v61  ;;  %v808_v2 = vmul.f32 %v1685_v59, %v2294_v4  ;;  %v852_v12 = vadd.f32 %v2333_v7, %v829_v58 }
 0x2c3   : > { %v1689_v26 = vpop.eup %1688  ;;  %v809_v56 = vmul.f32 %v1687_v63, %v2297_v5  ;;  %v924_v1 = vmul.f32 %v908_v60, %v860_v55  ;;  %1702 = verf.f32 %v883_v62  ;;  %v853_v13 = vadd.f32 %v2333_v7, %v830_v45 }
 0x2c4   : > { %v1691_v3 = vpop.eup %1690  ;;  %1489 = vmatprep.mubr.f32.mxu1 %v923_v0  ;;  %v909_v10 = vadd.f32 1.0, %v1689_v26  ;;  %v831_v19 = vmul.f32 %v2330_v9, %v808_v2  ;;  %v884_v21 = vmul.f32 0.70710677, %v852_v12  ;;  %v865_v42 = vmul.f32 0.5, %v2384_v50 }
 0x2c5   : > { %v1693_v6 = vpop.eup %1692  ;;  %1490 = vmatmul.mubr.f32.gmra.mrb[2].mxu1 %v924_v1  ;;  %v910_v16 = vadd.f32 1.0, %v1691_v3  ;;  %v832_v5 = vmul.f32 %v2330_v9, %v809_v56  ;;  %v885_v22 = vmul.f32 0.70710677, %v853_v13  ;;  %v866_v49 = vmul.f32 0.5, %v2387_v44  ;;  %v1324_v56 = vld [vmem:[%s448_s23] ss:$0 sm:$0xff] }
 0x2c6   : > { %v810_v20 = vmul.f32 %v1693_v6, %v2306_v15  ;;  %v925_v4 = vmul.f32 %v909_v10, %v861_v57  ;;  %v854_v23 = vadd.f32 %v2333_v7, %v831_v19  ;;  %v1695_v27 = vpop.eup %1694  ;;  %1704 = verf.f32 %v884_v21 }
 0x2c7   : > { %v926_v8 = vmul.f32 %v910_v16, %v862_v14  ;;  %v855_v11 = vadd.f32 %v2333_v7, %v832_v5  ;;  %v911_v29 = vadd.f32 1.0, %v1695_v27  ;;  %1706 = verf.f32 %v885_v22 }
 0x2c8   : > { %1492 = vmatprep.mubr.f32.mxu1 %v925_v4  ;;  %v833_v33 = vmul.f32 %v2330_v9, %v810_v20  ;;  %v1697_v28 = vpop.eup %1696  ;;  %v886_v15 = vmul.f32 0.70710677, %v854_v23  ;;  %v868_v52 = vmul.f32 0.5, %v852_v12  ;;  %v869_v53 = vmul.f32 0.5, %v853_v13 }
 0x2c9   : > { %1493 = vmatmul.mubr.f32.gmra.mrb[4].mxu1 %v926_v8  ;;  %v912_v24 = vadd.f32 1.0, %v1697_v28  ;;  %v887_v32 = vmul.f32 0.70710677, %v855_v11  ;;  %v927_v36 = vmul.f32 %v911_v29, %v863_v34  ;;  %v870_v60 = vmul.f32 0.5, %v854_v23 }
 0x2ca   : > { %v856_v35 = vadd.f32 %v2333_v7, %v833_v33  ;;  %1708 = verf.f32 %v886_v15  ;;  %v1699_v37 = vpop.eup %1698  ;;  %v867_v7 = vmul.f32 0.5, %v2391_v18  ;;  %v871_v18 = vmul.f32 0.5, %v855_v11 }
 0x2cb   : > { %v928_v38 = vmul.f32 %v912_v24, %v864_v30  ;;  %1710 = verf.f32 %v887_v32  ;;  %1495 = vmatprep.mubr.f32.mxu1 %v927_v36  ;;  %v913_v41 = vadd.f32 1.0, %v1699_v37 }
 0x2cc   : > { %v888_v39 = vmul.f32 0.70710677, %v856_v35  ;;  %v1701_v9 = vpop.eup %1700  ;;  %v872_v58 = vmul.f32 0.5, %v856_v35 }
 0x2cd   : > { %v1703_v40 = vpop.eup %1702  ;;  %1496 = vmatmul.mubr.f32.gmra.mrb[6].mxu1 %v928_v38  ;;  %v914_v31 = vadd.f32 1.0, %v1701_v9  ;;  %v929_v43 = vmul.f32 %v913_v41, %v865_v42 }
 0x2ce   : > { %1712 = verf.f32 %v888_v39  ;;  %v915_v17 = vadd.f32 1.0, %v1703_v40 }
 0x2cf   : > { %v930_v46 = vmul.f32 %v914_v31, %v866_v49  ;;  %1498 = vmatprep.mubr.f32.mxu1 %v929_v43 }
 0x2d0   : > { %v931_v47 = vmul.f32 %v915_v17, %v867_v7  ;;  %v1705_v48 = vpop.eup %1704 }
 0x2d1   : > { %1499 = vmatmul.mubr.f32.gmra.mrb[8].mxu1 %v930_v46  ;;  %v1707_v51 = vpop.eup %1706  ;;  %v916_v50 = vadd.f32 1.0, %v1705_v48 }
 0x2d2   : > { %1501 = vmatprep.mubr.f32.mxu1 %v931_v47  ;;  %v917_v54 = vadd.f32 1.0, %v1707_v51 }
 0x2d3   : > { %v932_v25 = vmul.f32 %v916_v50, %v868_v52 }
 0x2d4   : > { %v1709_v55 = vpop.eup %1708  ;;  %v933_v59 = vmul.f32 %v917_v54, %v869_v53 }
 0x2d5   : > { %v1711_v44 = vpop.eup %1710  ;;  %v918_v57 = vadd.f32 1.0, %v1709_v55  ;;  %1502 = vmatmul.mubr.f32.gmra.mrb[10].mxu1 %v932_v25 }
 0x2d6   : > { %v919_v61 = vadd.f32 1.0, %v1711_v44  ;;  %1504 = vmatprep.mubr.f32.mxu1 %v933_v59 }
 0x2d7   : > { %v934_v63 = vmul.f32 %v918_v57, %v870_v60 }
 0x2d8   : > { %v1713_v62 = vpop.eup %1712  ;;  %v935_v0 = vmul.f32 %v919_v61, %v871_v18 }
 0x2d9   : > { %v920_v45 = vadd.f32 1.0, %v1713_v62  ;;  %1505 = vmatmul.mubr.f32.gmra.mrb[12].mxu1 %v934_v63 }
 0x2da   : > { %1507 = vmatprep.mubr.f32.mxu1 %v935_v0 }
 0x2db   : > { %v936_v26 = vmul.f32 %v920_v45, %v872_v58 }
 0x2dd   : > { %1508 = vmatmul.mubr.f32.gmra.mrb[14].mxu1 %v936_v26 }
 0x394   : > { %v1488_v1 = vpop.f32.mrb[0].mxu1 }
 0x395   : > { %v1032_v2 = vadd.f32 %v1488_v1, %v1324_v56  ;;  %v1026_v3 = vpop.f32.mrb[1].mxu1 }
 0x396   : > { %v1027_v10 = vadd.f32 %v1324_v56, %v1026_v3 }
 0x397   : > { %1106 = vst [vmem:[%s2423_s20 + $0x8] sm:$0xff] %v1032_v2 }
 0x398   : > { %1105 = vst [vmem:[%s2423_s20] sm:$0xff] %v1027_v10  ;;  %v1491_v12 = vpop.f32.mrb[2].mxu1 }
 0x399   : > { %v1042_v13 = vadd.f32 %v1491_v12, %v1324_v56  ;;  %v1036_v6 = vpop.f32.mrb[3].mxu1 }
 0x39a   : > { %v1037_v14 = vadd.f32 %v1324_v56, %v1036_v6 }
 0x39b   : > { %1108 = vst [vmem:[%s2423_s20 + $0x18] sm:$0xff] %v1042_v13 }
 0x39c   : > { %1107 = vst [vmem:[%s2423_s20 + $0x10] sm:$0xff] %v1037_v14  ;;  %v1494_v16 = vpop.f32.mrb[4].mxu1 }
 0x39d   : > { %v1052_v19 = vadd.f32 %v1494_v16, %v1324_v56  ;;  %v1046_v5 = vpop.f32.mrb[5].mxu1 }
 0x39e   : > { %v1047_v20 = vadd.f32 %v1324_v56, %v1046_v5 }
 0x39f   : > { %1110 = vst [vmem:[%s2423_s20 + $0x28] sm:$0xff] %v1052_v19 }
 0x3a0   : > { %1109 = vst [vmem:[%s2423_s20 + $0x20] sm:$0xff] %v1047_v20  ;;  %v1497_v4 = vpop.f32.mrb[6].mxu1 }
 0x3a1   : > { %v1062_v21 = vadd.f32 %v1497_v4, %v1324_v56  ;;  %v1056_v8 = vpop.f32.mrb[7].mxu1 }
 0x3a2   : > { %v1057_v22 = vadd.f32 %v1324_v56, %v1056_v8 }
 0x3a3   : > { %1112 = vst [vmem:[%s2423_s20 + $0x38] sm:$0xff] %v1062_v21 }
 0x3a4   : > { %1111 = vst [vmem:[%s2423_s20 + $0x30] sm:$0xff] %v1057_v22  ;;  %v1500_v23 = vpop.f32.mrb[8].mxu1 }
 0x3a5   : > { %v1072_v27 = vadd.f32 %v1500_v23, %v1324_v56  ;;  %v1066_v11 = vpop.f32.mrb[9].mxu1 }
 0x3a6   : > { %v1067_v33 = vadd.f32 %v1324_v56, %v1066_v11 }
 0x3a7   : > { %1114 = vst [vmem:[%s2423_s20 + $0x48] sm:$0xff] %v1072_v27 }
 0x3a8   : > { %1113 = vst [vmem:[%s2423_s20 + $0x40] sm:$0xff] %v1067_v33  ;;  %v1503_v28 = vpop.f32.mrb[10].mxu1 }
 0x3a9   : > { %v1082_v34 = vadd.f32 %v1503_v28, %v1324_v56  ;;  %v1076_v29 = vpop.f32.mrb[11].mxu1 }
 0x3aa   : > { %v1077_v15 = vadd.f32 %v1324_v56, %v1076_v29 }
 0x3ab   : > { %1116 = vst [vmem:[%s2423_s20 + $0x58] sm:$0xff] %v1082_v34 }
 0x3ac   : > { %1115 = vst [vmem:[%s2423_s20 + $0x50] sm:$0xff] %v1077_v15  ;;  %v1506_v30 = vpop.f32.mrb[12].mxu1 }
 0x3ad   : > { %v1092_v24 = vadd.f32 %v1506_v30, %v1324_v56  ;;  %v1086_v32 = vpop.f32.mrb[13].mxu1 }
 0x3ae   : > { %v1087_v35 = vadd.f32 %v1324_v56, %v1086_v32 }
 0x3af   : > { %1118 = vst [vmem:[%s2423_s20 + $0x68] sm:$0xff] %v1092_v24 }
 0x3b0   : > { %1117 = vst [vmem:[%s2423_s20 + $0x60] sm:$0xff] %v1087_v35  ;;  %v1509_v36 = vpop.f32.mrb[14].mxu1 }
 0x3b1   : > { %v1102_v37 = vadd.f32 %v1509_v36, %v1324_v56  ;;  %v1096_v38 = vpop.f32.mrb[15].mxu1 }
 0x3b2   : > { %v1097_v39 = vadd.f32 %v1324_v56, %v1096_v38 }
 0x3b3   : > { %1120 = vst [vmem:[%s2423_s20 + $0x78] sm:$0xff] %v1102_v37 }
 0x3b4   : > { %1119 = vst [vmem:[%s2423_s20 + $0x70] sm:$0xff] %v1097_v39 }
 0x3b5   : > { %1817 = shalt.err (!%p1814_p11)
}
 0x3b6   : > { %s1818_s28 = scalar_lea.hbm %s2444_s30, 2048  ;;  %s1822_s8 = scalar_lea.hbm %s2542_s10, 4096 }
 0x3b7   : > { %p1819_p2 = scmp.ne.s32.totalorder %s2444_s30, %s1818_s28  ;;  %p1823_p4 = scmp.lt.u32.totalorder %s2444_s30, %s2542_s10 }
 0x3b8   : > { %p1824_p3 = scmp.lt.u32.totalorder %s1822_s8, %s1818_s28  ;;  %p1826_p10 = scmp.lt.u32.totalorder %s1818_s28, %s2444_s30 }
 0x3b9   : > { %p1820_p5 = pnand %p1819_p2, %p2543_p8 }
 0x3ba   : > { %p1825_p0 = por %p1824_p3, %p1823_p4 }
 0x3bb   : > { %p1821_p7 = pneg %p1820_p5 }
 0x3bc   : > { %p1827_p9 = por %p1826_p10, %p1825_p0 }
 0x3be   : > { %p1828_p12 = pnand %p1827_p9, %p1821_p7 }
 0x3c0   : > { %1831 = shalt.err (!%p1828_p12)
}
 0x3c1   : > { %s1898_s29 = smov 128   ;;  %s1899_s18 = smov 8  }
 0x3c2   : > { %1580 = dma.vmem_to_hbm [thread:$0]  (%p2543_p8), %s2446_s22, 2048, %s2444_s30, %s1122_s27, %s1898_s29, %s1898_s29, %s1899_s18  }
 0x3c3 PF: > { %s2544_s23 = sld [smem:[#allocation12_spill]]  ;;  %s2545_s20 = sld [smem:[#allocation17_spill]] }
 0x3c4   : > { %s2546_s12 = sld [smem:[#allocation14_spill]] }
 0x3c9   : > { %s1152_s11 = sand.u32 1, %s2544_s23   ;;  %p2547_p1 = scmp.ne.s32.totalorder %s2545_s20, 0 }
 0x3ca   : > { %p2548_p6 = scmp.ge.s32.totalorder %s2546_s12, 2  ;;  %s1153_s15 = scalar_lea.sflag [#allocation4], %s1152_s11 }
 0x3cc   : > { %p1593_p13 = pnand %p2548_p6, %p2547_p1 }
 0x3ce   : > { %1865 = dma.done.wait (!%p1593_p13), %s1153_s15, 2048  }
 0x3cf   : > { %1867 = vsyncadd (!%p1593_p13), %s1153_s15, 4294965248  ;;  %s26_s29 = sadd.s32 1, %s2546_s12   ;;  %s2549_s13 = sld [smem:[#allocation16_spill]] }
 0x3d0   : > { %p23_p11 = scmp.ge.s32.totalorder %s26_s29, 4   ;;  %s2550_s27 = sld [smem:[#allocation13_spill]] }
 0x3d1   : > { %s2551_s28 = sld [smem:[#allocation15_spill]]  ;;  %s2552_s24 = smov %s1874_s25 }
 0x3d2   : > { %s2553_s25 = smov %s1878_s26  ;;  %25 = sbr.rel (!%p23_p11) target bundleno = 11 (0xb), region = 129 }
 0x3d5   : > { %s2554_s26 = smov %s2549_s13 }
 0x3d9   :  { %1158 = vsyncpa [#allocation3], 1 }
 0x3da   :  { %1160 = vsyncpa [#allocation3 + $0x1], 1 }
 0x3db   :  { %1161 = vsyncpa [#allocation6], 1 }
 0x3dc   :  { %1163 = vsyncpa [#allocation6 + $0x1], 1 }
 0x3dd   :  { %1164 = vsyncpa [#allocation4], 1 }
 0x3de   :  { %1166 = vsyncpa [#allocation4 + $0x1], 1 }

</bundles_post_ra>
